<compile_context>
chip_gen: v7x
topology: tpu7x:2x2x1
jax: 0.10.0
libtpu: 0.0.40
codegen_flags: <defaults>
</compile_context>

<pallas_src>
import functools

import jax
import jax.numpy as jnp
from jax.experimental import pallas as pl
from jax.experimental.pallas import tpu as pltpu


def _focal_kernel(p0_ref, p1_ref, gt_ref, out_ref,
                  acc_loss_ref, acc_fg_loss_ref, acc_fg_ref,
                  *, gamma, alpha, eps, n_valid):
    i = pl.program_id(0)

    @pl.when(i == 0)
    def _init():
        acc_loss_ref[...] = jnp.zeros_like(acc_loss_ref)
        acc_fg_loss_ref[...] = jnp.zeros_like(acc_fg_loss_ref)
        acc_fg_ref[...] = jnp.zeros_like(acc_fg_ref)

    p0 = p0_ref[...]
    p1 = p1_ref[...]
    gt = gt_ref[...]                      # int32, values in {0, 1}; pads are 0

    is_fg = gt > 0
    fg = is_fg.astype(jnp.float32)
    pt = jnp.where(is_fg, p1, p0)         # pt = pred[gt] per pixel

    d = jnp.maximum(1.0 - pt, 0.0)        # clamp: avoid NaN if pt > 1 by ulps
    if gamma == 2.0:
        fw = d * d                        # strength-reduced pow (EUP-free)
    elif gamma == 1.0:
        fw = d
    elif gamma == 0.0:
        fw = jnp.ones_like(d)
    else:
        fw = d ** gamma
    loss = (-alpha) * fw * jnp.log(pt + eps)

    # Elementwise VPU accumulation; cross-lane reduce deferred to finalize.
    acc_loss_ref[...] += loss
    acc_fg_loss_ref[...] += loss * fg
    acc_fg_ref[...] += fg

    @pl.when(i == pl.num_programs(0) - 1)
    def _finalize():
        total_loss = jnp.sum(acc_loss_ref[...])
        fg_loss = jnp.sum(acc_fg_loss_ref[...])
        fg_cnt = jnp.sum(acc_fg_ref[...])
        bg_loss = total_loss - fg_loss
        bg_cnt = n_valid - fg_cnt         # static M excludes padded pixels
        out_ref[0, 0] = fg_loss / (fg_cnt + eps) + bg_loss / (bg_cnt + eps)


def _focal_loss_impl(pred, gt, gamma=2.0, alpha=1.0, epsilon=1e-8, tm=1024):
    """pred: (N, 2, H, W) float32, gt: (N, H, W) int -> scalar float32 loss."""
    N, C, H, W = pred.shape
    assert C == 2, "FocalLoss kernel expects 2-class predictions"
    LANE = 128
    M = N * H * W

    # Pick a tile height: as big as requested, multiple of 8, no bigger than
    # the (padded) number of rows actually needed.
    rows = -(-M // LANE)
    tm_eff = min(int(tm), ((rows + 7) // 8) * 8)
    tm_eff = max(8, ((tm_eff + 7) // 8) * 8)
    tile_elems = tm_eff * LANE
    Mp = -(-M // tile_elems) * tile_elems
    pad = Mp - M
    grid_steps = Mp // tile_elems
    R = Mp // LANE

    p0 = pred[:, 0, :, :].reshape(-1)
    p1 = pred[:, 1, :, :].reshape(-1)
    gti = gt.reshape(-1).astype(jnp.int32)

    if pad:
        # Padding chosen so the padded focal loss is exactly 0 and padded
        # pixels never count as foreground; bg count uses static M instead.
        p0 = jnp.pad(p0, (0, pad), constant_values=1.0)
        p1 = jnp.pad(p1, (0, pad), constant_values=1.0)
        gti = jnp.pad(gti, (0, pad), constant_values=0)

    p0 = p0.reshape(R, LANE)
    p1 = p1.reshape(R, LANE)
    gti = gti.reshape(R, LANE)

    tile_spec = pl.BlockSpec((tm_eff, LANE), lambda i: (i, 0))

    out = pl.pallas_call(
        functools.partial(_focal_kernel, gamma=float(gamma),
                          alpha=float(alpha), eps=float(epsilon),
                          n_valid=float(M)),
        out_shape=jax.ShapeDtypeStruct((1, 1), jnp.float32),
        grid_spec=pltpu.PrefetchScalarGridSpec(
            num_scalar_prefetch=0,
            grid=(grid_steps,),
            in_specs=[tile_spec, tile_spec, tile_spec],
            out_specs=pl.BlockSpec(memory_space=pltpu.MemorySpace.SMEM),
            scratch_shapes=[pltpu.VMEM((tm_eff, LANE), jnp.float32),
                            pltpu.VMEM((tm_eff, LANE), jnp.float32),
                            pltpu.VMEM((tm_eff, LANE), jnp.float32)],
        ),
        compiler_params=pltpu.CompilerParams(
            dimension_semantics=("arbitrary",)),
    )(p0, p1, gti)
    return out[0, 0]


# jit the wrapper so the slice / reshape / pad plumbing fuses instead of
# materializing extra full-size HBM arrays between XLA ops.
focal_loss = functools.partial(jax.jit, static_argnums=(2, 3, 4, 5))(
    _focal_loss_impl)


def focal_loss_ref(pred, gt, gamma=2.0, alpha=1.0, epsilon=1e-8):
    """Pure-JAX reference mirroring the PyTorch forward."""
    gt_one_hot = jax.nn.one_hot(gt, 2, dtype=jnp.float32)          # (N,H,W,2)
    gt_one_hot = jnp.transpose(gt_one_hot, (0, 3, 1, 2))           # (N,2,H,W)
    pt = jnp.sum(pred * gt_one_hot, axis=1)                        # (N,H,W)
    focal_weight = (1.0 - pt) ** gamma
    focal_loss_ = -alpha * focal_weight * jnp.log(pt + epsilon)
    fg_mask = (gt > 0).astype(jnp.float32)
    bg_mask = 1.0 - fg_mask
    fg = jnp.sum(focal_loss_ * fg_mask) / (jnp.sum(fg_mask) + epsilon)
    bg = jnp.sum(focal_loss_ * bg_mask) / (jnp.sum(bg_mask) + epsilon)
    return fg + bg


if __name__ == "__main__":
    key = jax.random.PRNGKey(0)
    k1, k2 = jax.random.split(key)

    N, C, H, W = 2, 2, 16, 16
    logits = jax.random.normal(k1, (N, C, H, W), jnp.float32)
    pred = jax.nn.softmax(logits, axis=1)                 # per-class probs
    gt = (jax.random.uniform(k2, (N, H, W)) > 0.5).astype(jnp.int32)

    loss = focal_loss(pred, gt)
    jax.block_until_ready(loss)

    ref = focal_loss_ref(pred, gt)
    jax.block_until_ready(ref)

    assert jnp.allclose(loss, ref, rtol=1e-5, atol=1e-5), (loss, ref)
    print("KERNEL_OK")
</pallas_src>

<mosaic_0001>
module attributes {stable_mosaic.version = 11 : i64} {
  func.func @_focal_kernel(%arg0: i32, %arg1: memref<8x128xf32, #tpu.memory_space<vmem>>, %arg2: memref<8x128xf32, #tpu.memory_space<vmem>>, %arg3: memref<8x128xi32, #tpu.memory_space<vmem>>, %arg4: memref<1x1xf32, #tpu.memory_space<smem>>, %arg5: memref<8x128xf32, #tpu.memory_space<vmem>>, %arg6: memref<8x128xf32, #tpu.memory_space<vmem>>, %arg7: memref<8x128xf32, #tpu.memory_space<vmem>>) attributes {dimension_semantics = [#tpu.dimension_semantics<arbitrary>], iteration_bounds = array<i64: 1>, scalar_prefetch = 0 : i64, scratch_operands = 3 : i64, tpu.core_type = #tpu.core_type<tc>, window_params = [{transform_indices = @transform_0, window_bounds = array<i64: 8, 128>}, {transform_indices = @transform_1, window_bounds = array<i64: 8, 128>}, {transform_indices = @transform_2, window_bounds = array<i64: 8, 128>}, {transform_indices = @transform_3, window_bounds = array<i64: 1, 1>}]} {
    %c0_i32 = arith.constant 0 : i32
    %0 = arith.cmpi eq, %arg0, %c0_i32 : i32
    %1 = arith.extui %0 : i1 to i32
    %c0_i32_0 = arith.constant 0 : i32
    %2 = arith.cmpi ne, %1, %c0_i32_0 : i32
    scf.if %2 {
      %cst_24 = arith.constant 0.000000e+00 : f32
      %35 = vector.broadcast %cst_24 : f32 to vector<8x128xf32>
      %c0_25 = arith.constant 0 : index
      %c0_26 = arith.constant 0 : index
      %36 = vector.load %arg5[%c0_25, %c0_26] : memref<8x128xf32, #tpu.memory_space<vmem>>, vector<8x128xf32>
      tpu.vector_store %arg5[%c0_25, %c0_26], %35 {strides = array<i32>} : memref<8x128xf32, #tpu.memory_space<vmem>>, vector<8x128xf32>,
      %cst_27 = arith.constant 0.000000e+00 : f32
      %37 = vector.broadcast %cst_27 : f32 to vector<8x128xf32>
      %c0_28 = arith.constant 0 : index
      %c0_29 = arith.constant 0 : index
      %38 = vector.load %arg6[%c0_28, %c0_29] : memref<8x128xf32, #tpu.memory_space<vmem>>, vector<8x128xf32>
      tpu.vector_store %arg6[%c0_28, %c0_29], %37 {strides = array<i32>} : memref<8x128xf32, #tpu.memory_space<vmem>>, vector<8x128xf32>,
      %cst_30 = arith.constant 0.000000e+00 : f32
      %39 = vector.broadcast %cst_30 : f32 to vector<8x128xf32>
      %c0_31 = arith.constant 0 : index
      %c0_32 = arith.constant 0 : index
      %40 = vector.load %arg7[%c0_31, %c0_32] : memref<8x128xf32, #tpu.memory_space<vmem>>, vector<8x128xf32>
      tpu.vector_store %arg7[%c0_31, %c0_32], %39 {strides = array<i32>} : memref<8x128xf32, #tpu.memory_space<vmem>>, vector<8x128xf32>,
    } else {
    }
    %c0 = arith.constant 0 : index
    %c0_1 = arith.constant 0 : index
    %3 = vector.load %arg1[%c0, %c0_1] : memref<8x128xf32, #tpu.memory_space<vmem>>, vector<8x128xf32>
    %c0_2 = arith.constant 0 : index
    %c0_3 = arith.constant 0 : index
    %4 = vector.load %arg2[%c0_2, %c0_3] : memref<8x128xf32, #tpu.memory_space<vmem>>, vector<8x128xf32>
    %c0_4 = arith.constant 0 : index
    %c0_5 = arith.constant 0 : index
    %5 = vector.load %arg3[%c0_4, %c0_5] : memref<8x128xi32, #tpu.memory_space<vmem>>, vector<8x128xi32>
    %c0_i32_6 = arith.constant 0 : i32
    %6 = vector.broadcast %c0_i32_6 : i32 to vector<8x128xi32>
    %7 = arith.cmpi sgt, %5, %6 : vector<8x128xi32>
    %8 = arith.extui %7 : vector<8x128xi1> to vector<8x128xi32>
    %9 = arith.sitofp %8 : vector<8x128xi32> to vector<8x128xf32>
    %10 = arith.select %7, %4, %3 : vector<8x128xi1>, vector<8x128xf32>
    %cst = arith.constant 1.000000e+00 : f32
    %11 = vector.broadcast %cst : f32 to vector<8x128xf32>
    %12 = arith.subf %11, %10 : vector<8x128xf32>
    %cst_7 = arith.constant 0.000000e+00 : f32
    %13 = vector.broadcast %cst_7 : f32 to vector<8x128xf32>
    %14 = arith.maximumf %12, %13 : vector<8x128xf32>
    %15 = arith.mulf %14, %14 : vector<8x128xf32>
    %cst_8 = arith.constant -1.000000e+00 : f32
    %16 = vector.broadcast %cst_8 : f32 to vector<8x128xf32>
    %17 = arith.mulf %16, %15 : vector<8x128xf32>
    %cst_9 = arith.constant 9.99999993E-9 : f32
    %18 = vector.broadcast %cst_9 : f32 to vector<8x128xf32>
    %19 = arith.addf %10, %18 : vector<8x128xf32>
    %20 = math.log %19 : vector<8x128xf32>
    %21 = arith.mulf %17, %20 : vector<8x128xf32>
    %c0_10 = arith.constant 0 : index
    %c0_11 = arith.constant 0 : index
    %22 = vector.load %arg5[%c0_10, %c0_11] : memref<8x128xf32, #tpu.memory_space<vmem>>, vector<8x128xf32>
    %23 = arith.addf %22, %21 : vector<8x128xf32>
    %c0_12 = arith.constant 0 : index
    %c0_13 = arith.constant 0 : index
    %24 = vector.load %arg5[%c0_12, %c0_13] : memref<8x128xf32, #tpu.memory_space<vmem>>, vector<8x128xf32>
    tpu.vector_store %arg5[%c0_12, %c0_13], %23 {strides = array<i32>} : memref<8x128xf32, #tpu.memory_space<vmem>>, vector<8x128xf32>,
    %c0_14 = arith.constant 0 : index
    %c0_15 = arith.constant 0 : index
    %25 = vector.load %arg6[%c0_14, %c0_15] : memref<8x128xf32, #tpu.memory_space<vmem>>, vector<8x128xf32>
    %26 = arith.mulf %21, %9 : vector<8x128xf32>
    %27 = arith.addf %25, %26 : vector<8x128xf32>
    %c0_16 = arith.constant 0 : index
    %c0_17 = arith.constant 0 : index
    %28 = vector.load %arg6[%c0_16, %c0_17] : memref<8x128xf32, #tpu.memory_space<vmem>>, vector<8x128xf32>
    tpu.vector_store %arg6[%c0_16, %c0_17], %27 {strides = array<i32>} : memref<8x128xf32, #tpu.memory_space<vmem>>, vector<8x128xf32>,
    %c0_18 = arith.constant 0 : index
    %c0_19 = arith.constant 0 : index
    %29 = vector.load %arg7[%c0_18, %c0_19] : memref<8x128xf32, #tpu.memory_space<vmem>>, vector<8x128xf32>
    %30 = arith.addf %29, %9 : vector<8x128xf32>
    %c0_20 = arith.constant 0 : index
    %c0_21 = arith.constant 0 : index
    %31 = vector.load %arg7[%c0_20, %c0_21] : memref<8x128xf32, #tpu.memory_space<vmem>>, vector<8x128xf32>
    tpu.vector_store %arg7[%c0_20, %c0_21], %30 {strides = array<i32>} : memref<8x128xf32, #tpu.memory_space<vmem>>, vector<8x128xf32>,
    %c0_i32_22 = arith.constant 0 : i32
    %32 = arith.cmpi eq, %arg0, %c0_i32_22 : i32
    %33 = arith.extui %32 : i1 to i32
    %c0_i32_23 = arith.constant 0 : i32
    %34 = arith.cmpi ne, %33, %c0_i32_23 : i32
    scf.if %34 {
      %c0_24 = arith.constant 0 : index
      %c0_25 = arith.constant 0 : index
      %35 = vector.load %arg5[%c0_24, %c0_25] : memref<8x128xf32, #tpu.memory_space<vmem>>, vector<8x128xf32>
      %36 = vector.shape_cast %35 : vector<8x128xf32> to vector<1x8x128xf32>
      %cst_26 = arith.constant dense<0.000000e+00> : vector<1xf32>
      %37 = vector.multi_reduction <add>, %36, %cst_26 [1, 2] : vector<1x8x128xf32> to vector<1xf32>
      %38 = vector.shape_cast %37 : vector<1xf32> to vector<1x1x1xf32>
      %39 = vector.extract %38[0, 0, 0] : f32 from vector<1x1x1xf32>
      %c0_27 = arith.constant 0 : index
      %c0_28 = arith.constant 0 : index
      %40 = vector.load %arg6[%c0_27, %c0_28] : memref<8x128xf32, #tpu.memory_space<vmem>>, vector<8x128xf32>
      %41 = vector.shape_cast %40 : vector<8x128xf32> to vector<1x8x128xf32>
      %cst_29 = arith.constant dense<0.000000e+00> : vector<1xf32>
      %42 = vector.multi_reduction <add>, %41, %cst_29 [1, 2] : vector<1x8x128xf32> to vector<1xf32>
      %43 = vector.shape_cast %42 : vector<1xf32> to vector<1x1x1xf32>
      %44 = vector.extract %43[0, 0, 0] : f32 from vector<1x1x1xf32>
      %c0_30 = arith.constant 0 : index
      %c0_31 = arith.constant 0 : index
      %45 = vector.load %arg7[%c0_30, %c0_31] : memref<8x128xf32, #tpu.memory_space<vmem>>, vector<8x128xf32>
      %46 = vector.shape_cast %45 : vector<8x128xf32> to vector<1x8x128xf32>
      %cst_32 = arith.constant dense<0.000000e+00> : vector<1xf32>
      %47 = vector.multi_reduction <add>, %46, %cst_32 [1, 2] : vector<1x8x128xf32> to vector<1xf32>
      %48 = vector.shape_cast %47 : vector<1xf32> to vector<1x1x1xf32>
      %49 = vector.extract %48[0, 0, 0] : f32 from vector<1x1x1xf32>
      %50 = arith.subf %39, %44 : f32
      %cst_33 = arith.constant 5.120000e+02 : f32
      %51 = arith.subf %cst_33, %49 : f32
      %cst_34 = arith.constant 9.99999993E-9 : f32
      %52 = arith.addf %49, %cst_34 : f32
      %53 = arith.divf %44, %52 : f32
      %cst_35 = arith.constant 9.99999993E-9 : f32
      %54 = arith.addf %51, %cst_35 : f32
      %55 = arith.divf %50, %54 : f32
      %56 = arith.addf %53, %55 : f32
      %c0_36 = arith.constant 0 : index
      %c0_37 = arith.constant 0 : index
      %57 = memref.load %arg4[%c0_36, %c0_37] : memref<1x1xf32, #tpu.memory_space<smem>>
      memref.store %56, %arg4[%c0_36, %c0_37] : memref<1x1xf32, #tpu.memory_space<smem>>
    } else {
    }
    return
  }
  func.func @transform_0(%arg0: i32) -> (i32, i32) {
    %c0_i32 = arith.constant 0 : i32
    %c0_i32_0 = arith.constant 0 : i32
    return %arg0, %c0_i32 : i32, i32
  }
  func.func @transform_1(%arg0: i32) -> (i32, i32) {
    %c0_i32 = arith.constant 0 : i32
    %c0_i32_0 = arith.constant 0 : i32
    return %arg0, %c0_i32 : i32, i32
  }
  func.func @transform_2(%arg0: i32) -> (i32, i32) {
    %c0_i32 = arith.constant 0 : i32
    %c0_i32_0 = arith.constant 0 : i32
    return %arg0, %c0_i32 : i32, i32
  }
  func.func @transform_3(%arg0: i32) -> (i32, i32) {
    %c0_i32 = arith.constant 0 : i32
    %c0_i32_0 = arith.constant 0 : i32
    %c0_i32_1 = arith.constant 0 : i32
    return %c0_i32, %c0_i32_0 : i32, i32
  }
}

</mosaic_0001>

<bundles_post_ra>
// kernel: squeeze.3
= control target key start
LH: loop header
LB: loop body
LE: loop exit
PB: predicated region body
PF: predicated region fallthrough
CT: control target
= control target key end

     0   :  { %s67_s8 = smov 112   ;;  %s68_s11 = smov 80   ;;  %vm3_vm0 = vcmask 130048   ;;  %vm9_vm1 = vcmask 1048448   ;;  %vm15_vm2 = vcmask 917248   ;;  %vm21_vm3 = vcmask 786048   ;;  %s111_s0 = inlined_call_operand.vmem [shape: f32[2,1,16,16], index: 0, kind: input, shape index: {}]   ;;  %s112_s1 = inlined_call_operand.vmem [shape: f32[512], index: 1, kind: output, shape index: {}]  }
   0x1   :  { %v53_v0 = vld [vmem:[%s111_s0 + $0x7] ss:$8 sm:$0xf]   ;;  %v55_v1 = vld [vmem:[%s111_s0 + $0x5] ss:$8 sm:$0xf]  }
   0x2   :  { %7 = vrot.lane.b32.xlu0 %v53_v0, %s67_s8  ;;  %19 = vrot.lane.b32.xlu1 %v55_v1, %s68_s11  ;;  %v54_v2 = vld [vmem:[%s111_s0 + $0x6] ss:$8 sm:$0xf]   ;;  %v56_v3 = vld [vmem:[%s111_s0 + $0x4] ss:$8 sm:$0xf]  }
   0x3   :  { %s69_s16 = smov 96   ;;  %v2_v4 = vld [vmem:[%s111_s0] ss:$8 sm:$0xf]   ;;  %s70_s19 = smov 64   ;;  %vm27_vm4 = vcmask 654848  }
   0x4   :  { %v57_v5 = vld [vmem:[%s111_s0 + $0x3] ss:$8 sm:$0xf]   ;;  %4 = vst.msk [vmem:[#allocation0] sm:$0xf] %vm3_vm0, %v2_v4   ;;  %s71_s24 = smov 48  }
   0x5   :  { %v58_v6 = vld [vmem:[%s111_s0 + $0x2] ss:$8 sm:$0xf]   ;;  %s72_s25 = smov 32   ;;  %vm33_vm5 = vcmask 523648   ;;  %vm39_vm6 = vcmask 392448  }
   0x6   :  { %13 = vrot.lane.b32.xlu0 %v54_v2, %s69_s16  ;;  %25 = vrot.lane.b32.xlu1 %v56_v3, %s70_s19  ;;  %v59_v7 = vld [vmem:[%s111_s0 + $0x1] ss:$8 sm:$0xf]   ;;  %s73_s0 = smov 16   ;;  %vm45_vm7 = vcmask 261248  }
   0xa   :  { %31 = vrot.lane.b32.xlu0 %v57_v5, %s71_s24  ;;  %37 = vrot.lane.b32.xlu1 %v58_v6, %s72_s25 }
   0xe   :  { %43 = vrot.lane.b32.xlu0 %v59_v7, %s73_s0 }
  0x74   :  { %v8_v8 = vpop.permute.xlu0 %7   ;;  %v20_v9 = vpop.permute.xlu1 %19  }
  0x75   :  { %10 = vst.msk [vmem:[#allocation0] sm:$0xf] %vm9_vm1, %v8_v8  }
  0x78   :  { %v14_v10 = vpop.permute.xlu0 %13   ;;  %v26_v11 = vpop.permute.xlu1 %25  }
  0x79   :  { %16 = vst.msk [vmem:[#allocation0] sm:$0xf] %vm15_vm2, %v14_v10  }
  0x7a   :  { %22 = vst.msk [vmem:[#allocation0] sm:$0xf] %vm21_vm3, %v20_v9  }
  0x7b   :  { %28 = vst.msk [vmem:[#allocation0] sm:$0xf] %vm27_vm4, %v26_v11  }
  0x7c   :  { %v32_v12 = vpop.permute.xlu0 %31   ;;  %v38_v13 = vpop.permute.xlu1 %37  }
  0x7d   :  { %34 = vst.msk [vmem:[#allocation0] sm:$0xf] %vm33_vm5, %v32_v12  }
  0x7e   :  { %40 = vst.msk [vmem:[#allocation0] sm:$0xf] %vm39_vm6, %v38_v13  }
  0x80   :  { %v44_v14 = vpop.permute.xlu0 %43  }
  0x81   :  { %46 = vst.msk [vmem:[#allocation0] sm:$0xf] %vm45_vm7, %v44_v14  }
  0x88   :  { %v50_v15 = vld [vmem:[#allocation0] sm:$0xf] }
  0x89   :  { %52 = vst [vmem:[%s112_s1] sm:$0xf] %v50_v15 }

// kernel: _focal_loss_impl.1
= control target key start
LH: loop header
LB: loop body
LE: loop exit
PB: predicated region body
PF: predicated region fallthrough
CT: control target
= control target key end

     0   :  { %s182_s0 = inlined_call_operand.vmem [shape: f32[8,128], index: 0, kind: input, shape index: {}]   ;;  %s183_s1 = inlined_call_operand.vmem [shape: f32[8,128], index: 1, kind: input, shape index: {}]   ;;  %s184_s2 = inlined_call_operand.vmem [shape: s32[8,128], index: 2, kind: input, shape index: {}]   ;;  %s185_s3 = inlined_call_operand.hbm [shape: f32[1,1], index: 3, kind: output, shape index: {}]  }
   0x1   :  { %v24_v0 = vld [vmem:[%s184_s2] sm:$0xff] }
   0x2   :  { %v22_v1 = vld [vmem:[%s182_s0] sm:$0xff]  ;;  %vm25_vm0 = vcmp.gt.s32.totalorder %v24_v0, 0 }
   0x3   :  { %v23_v2 = vld [vmem:[%s183_s1] sm:$0xff] }
   0x4   :  { %8 = vsyncpa [#allocation6], 0  ;;  %v139_v3 = vmov 0.0   ;;  %v28_v5 = vsel %vm25_vm0, %v23_v2, %v22_v1  ;;  %s127_s29 = scalar_lea.hbm %s185_s3, 16 }
   0x5   :  { %v108_v4 = vsel %vm25_vm0, 1.0, %v139_v3  ;;  %v29_v6 = vsub.f32 1.0, %v28_v5  ;;  %v33_v7 = vadd.f32 1e-08, %v28_v5  ;;  %p128_p0 = scmp.ne.s32.totalorder %s185_s3, %s127_s29  ;;  %p131_p1 = scmp.lt.u32.totalorder %s127_s29, %s185_s3 }
   0x6   :  { %71 = vadd.xlane.f32.xlu1 %v108_v4 }
   0x7   :  { %121 = vlog2.f32 %v33_v7  ;;  %v30_v8 = vmax.f32 %v29_v6, 0.0  ;;  %p133_p2 = pnand %p131_p1, %p128_p0 }
   0x9   :  { %v31_v9 = vmul.f32 %v30_v8, %v30_v8 }
   0xb   :  { %v32_v10 = vmul.f32 -1.0, %v31_v9 }
  0x11   :  { %v122_v11 = vpop.eup %121 }
  0x12   :  { %v35_v12 = vmul.f32 0.6931472, %v122_v11 }
  0x14   :  { %v36_v13 = vmul.f32 %v35_v12, %v32_v10 }
  0x16   :  { %51 = vadd.xlane.f32.xlu0 %v36_v13  ;;  %v41_v14 = vmul.f32 %v108_v4, %v36_v13 }
  0x1a   :  { %61 = vadd.xlane.f32.xlu0 %v41_v14 }
  0x93   :  { %v72_v15 = vpop.xlane.xlu1 %71 }
  0x94   :  { %v73_v16 = vrot.slane %v72_v15, 4 }
  0x96   :  { %v74_v17 = vadd.f32 %v73_v16, %v72_v15 }
  0x98   :  { %v75_v21 = vrot.slane %v74_v17, 2 }
  0x9a   :  { %v76_v27 = vadd.f32 %v75_v21, %v74_v17 }
  0x9c   :  { %v77_v32 = vrot.slane %v76_v27, 1 }
  0x9e   :  { %v78_v35 = vadd.f32 %v77_v32, %v76_v27 }
  0xa3   :  { %v52_v18 = vpop.xlane.xlu0 %51 }
  0xa4   :  { %v53_v19 = vrot.slane %v52_v18, 4 }
  0xa6   :  { %v54_v20 = vadd.f32 %v53_v19, %v52_v18 }
  0xa7   :  { %v62_v22 = vpop.xlane.xlu0 %61 }
  0xa8   :  { %v55_v23 = vrot.slane %v54_v20, 2  ;;  %v63_v24 = vrot.slane %v62_v22, 4 }
  0xaa   :  { %v64_v25 = vadd.f32 %v63_v24, %v62_v22  ;;  %v56_v26 = vadd.f32 %v55_v23, %v54_v20 }
  0xac   :  { %v65_v28 = vrot.slane %v64_v25, 2  ;;  %v57_v29 = vrot.slane %v56_v26, 1 }
  0xae   :  { %v66_v30 = vadd.f32 %v65_v28, %v64_v25  ;;  %v58_v31 = vadd.f32 %v57_v29, %v56_v26 }
  0xb0   :  { %109 = vpush %v58_v31  ;;  %v67_v33 = vrot.slane %v66_v30, 1 }
  0xb2   :  { %v68_v34 = vadd.f32 %v67_v33, %v66_v30 }
  0xb4   :  { %111 = vpush %v68_v34 }
  0xb5   :  { %113 = vpush %v78_v35 }
  0xe1   :  { %s110_s0 = spop %109 }
  0xe5   :  { %s112_s1 = spop %111 }
  0xe6   :  { %s114_s2 = spop %113  ;;  %s80_s21 = ssub.f32 %s110_s0, %s112_s1 }
  0xe7   :  { %s81_s18 = ssub.f32 512.0, %s114_s2 }
  0xe8   :  { %s82_s19 = sadd.f32 1e-08, %s114_s2 }
  0xe9   :  { %s87_s20 = sadd.f32 1e-08, %s81_s18 }
  0xea   :  { %v83_v36 = vstv %s82_s19 }
  0xeb   :  { %123 = vrcp.f32 %v83_v36  ;;  %v88_v37 = vstv %s87_s20 }
  0xec   :  { %125 = vrcp.f32 %v88_v37 }
  0xf5   :  { %v124_v38 = vpop.eup %123 }
  0xf6   :  { %v126_v39 = vpop.eup %125  ;;  %115 = vpush %v124_v38 }
  0xf7   :  { %117 = vpush %v126_v39 }
 0x127   :  { %s116_s22 = spop %115 }
 0x128   :  { %s86_s23 = smul.f32 %s116_s22, %s112_s1  ;;  %s118_s24 = spop %117 }
 0x129   :  { %s91_s25 = smul.f32 %s118_s24, %s80_s21 }
 0x12b   :  { %s92_s26 = sadd.f32 %s91_s25, %s86_s23 }
 0x12d   :  { %94 = sst [smem:[#allocation5]] %s92_s26 }
 0x12e   :  { %136 = shalt.err (!%p133_p2)
}
 0x12f   :  { %s140_s7 = smov [#allocation5]  }
 0x130   :  { %102 = dma.smem_to_hbm %s140_s7, 16, %s185_s3, [#allocation6]  }
 0x131   :  { %137 = dma.done.wait [#allocation6], 16  }
 0x132   :  { %138 = vsyncadd [#allocation6], 4294967280 }
 0x133   :  { %106 = sfence }
 0x134   :  { %107 = vsyncpa [#allocation6], 1 }

</bundles_post_ra>
